<compile_context>
chip_gen: v7x
topology: tpu7x:2x2x1
jax: 0.10.0
libtpu: 0.0.40
codegen_flags: <defaults>
</compile_context>

<pallas_src>
import math
import functools

import jax
import jax.numpy as jnp
from jax import lax
from jax.experimental import pallas as pl
from jax.experimental.pallas import tpu as pltpu


# ----------------------------------------------------------------------------
# Parameter setup (mirrors PositionalEncoding.__init__)
# ----------------------------------------------------------------------------
def make_pe_table(d_model: int, max_len: int) -> jnp.ndarray:
    """Returns the (max_len, 1, d_model) sinusoidal table, matching torch."""
    position = jnp.arange(0, max_len, dtype=jnp.float32)[:, None]          # (L, 1)
    div_term = jnp.exp(
        jnp.arange(0, d_model, 2, dtype=jnp.float32) * (-math.log(10000.0) / d_model)
    )                                                                       # (D/2,)
    pe = jnp.zeros((max_len, d_model), dtype=jnp.float32)
    pe = pe.at[:, 0::2].set(jnp.sin(position * div_term))
    pe = pe.at[:, 1::2].set(jnp.cos(position * div_term))
    # unsqueeze(0).transpose(0, 1) -> (max_len, 1, d_model)
    return pe[:, None, :]


# ----------------------------------------------------------------------------
# Pallas kernels
# ----------------------------------------------------------------------------
def pe_add_kernel(x_ref, pe_ref, o_ref):
    # eval-mode forward: dropout is identity; pe broadcasts over batch.
    o_ref[...] = (x_ref[...] + pe_ref[...]).astype(o_ref.dtype)


def pe_add_dropout_prng_kernel(seed_ref, x_ref, pe_ref, o_ref, *,
                               threshold: int, inv_keep: float):
    # training-mode forward: inverted dropout, mask from the HW PRNG.
    # TODO(synk): RNG stream cannot bit-match torch's dropout; semantics match.
    y = x_ref[...] + pe_ref[...]                              # pe broadcasts over batch

    # Distinct stream per grid tile.
    tile_id = pl.program_id(0) * pl.num_programs(1) + pl.program_id(1)
    pltpu.prng_seed(seed_ref[0] + tile_id)
    bits = pltpu.prng_random_bits(y.shape)
    if bits.dtype != jnp.uint32:                              # trace-time check
        bits = pltpu.bitcast(bits, jnp.uint32)

    keep = bits >= jnp.uint32(threshold)                      # drop iff bits < p*2^32
    scaled = y.astype(jnp.float32) * jnp.float32(inv_keep)    # scale in f32, cast at store
    o_ref[...] = jnp.where(keep, scaled, 0.0).astype(o_ref.dtype)


def pe_add_dropout_hash_kernel(seed_ref, x_ref, pe_ref, o_ref, *,
                               threshold: int, inv_keep: float, block_elems: int):
    # Portability / interpret-mode fallback: stateless per-element integer hash.
    y = x_ref[...] + pe_ref[...]
    ts, b, td = y.shape

    tile_id = pl.program_id(0) * pl.num_programs(1) + pl.program_id(1)
    base = (tile_id.astype(jnp.uint32) * jnp.uint32(block_elems)
            + seed_ref[0].astype(jnp.uint32) * jnp.uint32(0x9E3779B9))

    s_i = lax.broadcasted_iota(jnp.int32, y.shape, 0)
    b_i = lax.broadcasted_iota(jnp.int32, y.shape, 1)
    d_i = lax.broadcasted_iota(jnp.int32, y.shape, 2)
    idx_i = (s_i * b + b_i) * td + d_i                        # unique within tile
    idx = pltpu.bitcast(idx_i, jnp.uint32) + base             # unique across tiles

    # murmur3-style finalizer; compare the full (well-mixed) 32 bits.
    h = idx * jnp.uint32(0x9E3779B1)
    h = h ^ (h >> 16)
    h = h * jnp.uint32(0x85EBCA6B)
    h = h ^ (h >> 13)
    keep = h >= jnp.uint32(threshold)

    scaled = y.astype(jnp.float32) * jnp.float32(inv_keep)
    o_ref[...] = jnp.where(keep, scaled, 0.0).astype(o_ref.dtype)


# ----------------------------------------------------------------------------
# Wrapper
# ----------------------------------------------------------------------------
def positional_encoding_fwd(x, pe_table, *, p=0.1, training=False, seed=0,
                            use_hw_prng=True,
                            vmem_tile_bytes=4 * 1024 * 1024,
                            min_seq_steps=8):
    """x: (S, B, D). Returns x + pe[:S] (with inverted dropout if training)."""
    S, B, D = x.shape
    max_len = pe_table.shape[0]
    assert S <= max_len, "sequence length exceeds pe table max_len"

    # Cast pe once: in-kernel add stays in x.dtype (no f32 promote for bf16)
    # and the pe stream costs half the bytes for bf16 activations.
    pe = pe_table.astype(x.dtype)
    itemsize = jnp.dtype(x.dtype).itemsize

    # ---- tile selection -----------------------------------------------------
    # Split d_model only when a single (*, B, D) slab would blow the per-tile
    # budget (keeps v5e 16 MiB / v7x 32 MiB scoped-VMEM defaults safe for big B*D).
    if B * D * itemsize <= vmem_tile_bytes or D <= 128:
        td = D
    else:
        td = (vmem_tile_bytes // (B * itemsize)) // 128 * 128
        td = int(min(D, max(128, td)))                        # multiple of 128 (or == D)

    # Sequence tiling: fill the tile budget, but always leave >= min_seq_steps
    # grid steps so the "parallel" axis shards across v7x's 2 TensorCores and
    # the DMA pipeline has steps to overlap.
    ts = max(1, vmem_tile_bytes // (B * td * itemsize))
    ts = min(ts, max(1, pl.cdiv(S, min_seq_steps)))
    if ts >= 8:
        ts -= ts % 8                                          # uniform steps, no ragged tail
    ts = int(min(ts, S))
    grid = (pl.cdiv(S, ts), pl.cdiv(D, td))

    x_spec = pl.BlockSpec((ts, B, td), lambda i, j: (i, 0, j))
    pe_spec = pl.BlockSpec((ts, 1, td), lambda i, j: (i, 0, j))
    out_shape = jax.ShapeDtypeStruct((S, B, D), x.dtype)
    cparams = pltpu.CompilerParams(
        dimension_semantics=("parallel", "parallel"),
        vmem_limit_bytes=32 * 1024 * 1024,
    )

    if (not training) or p == 0.0:
        return pl.pallas_call(
            pe_add_kernel,
            out_shape=out_shape,
            grid=grid,
            in_specs=[x_spec, pe_spec],
            out_specs=x_spec,
            input_output_aliases={0: 0},        # full overwrite of x -> in-place
            compiler_params=cparams,
        )(x, pe)

    threshold = min(int(round(float(p) * float(1 << 32))), (1 << 32) - 1)
    inv_keep = 1.0 / (1.0 - float(p))
    if use_hw_prng:
        kern = functools.partial(pe_add_dropout_prng_kernel,
                                 threshold=threshold, inv_keep=inv_keep)
    else:
        kern = functools.partial(pe_add_dropout_hash_kernel,
                                 threshold=threshold, inv_keep=inv_keep,
                                 block_elems=ts * B * td)

    seed_arr = jnp.asarray([seed], dtype=jnp.int32)
    return pl.pallas_call(
        kern,
        out_shape=out_shape,
        grid=grid,
        in_specs=[
            pl.BlockSpec(memory_space=pltpu.MemorySpace.SMEM),   # seed scalar
            x_spec,
            pe_spec,
        ],
        out_specs=x_spec,
        input_output_aliases={1: 0},            # alias x -> out (full overwrite)
        compiler_params=cparams,
    )(seed_arr, x, pe)


# ----------------------------------------------------------------------------
# Demo / correctness check
# ----------------------------------------------------------------------------
if __name__ == "__main__":
    d_model = 128     # lane-dense last dim
    max_len = 64
    seq_len = 16
    batch = 8         # sublane-dense batch dim
    p_drop = 0.1

    key = jax.random.PRNGKey(0)
    x = jax.random.normal(key, (seq_len, batch, d_model), dtype=jnp.float32)

    pe_table = make_pe_table(d_model, max_len)
    ref = x + pe_table[:seq_len]

    # eval-mode (deterministic) path: check against pure-JAX reference
    out_eval = jax.block_until_ready(
        positional_encoding_fwd(x, pe_table, p=p_drop, training=False))
    assert out_eval.shape == (seq_len, batch, d_model)
    assert jnp.allclose(out_eval, ref, atol=1e-6), "eval-mode mismatch"

    # training-mode path (dropout inside the kernel, HW PRNG by default)
    try:
        out_train = positional_encoding_fwd(x, pe_table, p=p_drop, training=True,
                                            seed=123)
    except Exception:
        # TODO(synk): back-ends without the HW-PRNG lowering (e.g. interpret
        # mode) use the stateless integer-hash dropout kernel instead.
        out_train = positional_encoding_fwd(x, pe_table, p=p_drop, training=True,
                                            seed=123, use_hw_prng=False)
    out_train = jax.block_until_ready(out_train)
    assert out_train.shape == (seq_len, batch, d_model)

    # kept elements must equal (x + pe) / (1 - p); dropped elements are zero
    kept = out_train != 0          # demo-only: misclassifies an exact zero of x+pe
    scale = 1.0 / (1.0 - p_drop)
    assert jnp.allclose(jnp.where(kept, out_train, 0.0),
                        jnp.where(kept, ref * scale, 0.0), atol=1e-5), \
        "dropout scale mismatch"
    drop_rate = 1.0 - float(jnp.mean(kept.astype(jnp.float32)))
    assert 0.0 < drop_rate < 0.5, f"implausible drop rate {drop_rate}"

    print("KERNEL_OK")
</pallas_src>

<mosaic_0001>
module attributes {stable_mosaic.version = 11 : i64} {
  func.func @pe_add_kernel(%arg0: i32, %arg1: i32, %arg2: memref<2x8x128xf32, #tpu.memory_space<vmem>>, %arg3: memref<2x1x128xf32, #tpu.memory_space<vmem>>, %arg4: memref<2x8x128xf32, #tpu.memory_space<vmem>>) attributes {dimension_semantics = [#tpu.dimension_semantics<parallel>, #tpu.dimension_semantics<parallel>], iteration_bounds = array<i64: 8, 1>, scalar_prefetch = 0 : i64, scratch_operands = 0 : i64, tpu.core_type = #tpu.core_type<tc>, window_params = [{transform_indices = @transform_0, window_bounds = array<i64: 2, 8, 128>}, {transform_indices = @transform_1, window_bounds = array<i64: 2, 1, 128>}, {transform_indices = @transform_2, window_bounds = array<i64: 2, 8, 128>}]} {
    %c0 = arith.constant 0 : index
    %c0_0 = arith.constant 0 : index
    %c0_1 = arith.constant 0 : index
    %0 = vector.load %arg2[%c0, %c0_0, %c0_1] : memref<2x8x128xf32, #tpu.memory_space<vmem>>, vector<2x8x128xf32>
    %c0_2 = arith.constant 0 : index
    %c0_3 = arith.constant 0 : index
    %c0_4 = arith.constant 0 : index
    %1 = vector.load %arg3[%c0_2, %c0_3, %c0_4] : memref<2x1x128xf32, #tpu.memory_space<vmem>>, vector<2x1x128xf32>
    %2 = vector.broadcast %1 : vector<2x1x128xf32> to vector<2x8x128xf32>
    %3 = arith.addf %0, %2 : vector<2x8x128xf32>
    %c0_5 = arith.constant 0 : index
    %c0_6 = arith.constant 0 : index
    %c0_7 = arith.constant 0 : index
    %4 = vector.load %arg4[%c0_5, %c0_6, %c0_7] : memref<2x8x128xf32, #tpu.memory_space<vmem>>, vector<2x8x128xf32>
    tpu.vector_store %arg4[%c0_5, %c0_6, %c0_7], %3 {strides = array<i32>} : memref<2x8x128xf32, #tpu.memory_space<vmem>>, vector<2x8x128xf32>,
    return
  }
  func.func @transform_0(%arg0: i32, %arg1: i32) -> (i32, i32, i32) {
    %c0_i32 = arith.constant 0 : i32
    %c0_i32_0 = arith.constant 0 : i32
    return %arg0, %c0_i32, %arg1 : i32, i32, i32
  }
  func.func @transform_1(%arg0: i32, %arg1: i32) -> (i32, i32, i32) {
    %c0_i32 = arith.constant 0 : i32
    %c0_i32_0 = arith.constant 0 : i32
    return %arg0, %c0_i32, %arg1 : i32, i32, i32
  }
  func.func @transform_2(%arg0: i32, %arg1: i32) -> (i32, i32, i32) {
    %c0_i32 = arith.constant 0 : i32
    %c0_i32_0 = arith.constant 0 : i32
    return %arg0, %c0_i32, %arg1 : i32, i32, i32
  }
}

</mosaic_0001>

<bundles_post_ra>
// kernel: tpu_custom_call.1
= control target key start
LH: loop header
LB: loop body
LE: loop exit
PB: predicated region body
PF: predicated region fallthrough
CT: control target
= control target key end

     0   :  { %7 = vsyncpa [#allocation3], 0  ;;  %s741_s0 = inlined_call_operand.hbm [shape: f32[16,8,128], index: 0, kind: input, shape index: {}, may-alias: {0,2}]   ;;  %s742_s1 = inlined_call_operand.vmem [shape: f32[64,1,128], index: 1, kind: input, shape index: {}]   ;;  %s743_s2 = inlined_call_operand.hbm [shape: f32[16,8,128], index: 2, kind: output, shape index: {}, may-alias: {0,2}]  }
   0x1   :  { %9 = vsyncpa [#allocation3 + $0x1], 0 }
   0x2   :  { %10 = vsyncpa [#allocation4], 0 }
   0x3   :  { %12 = vsyncpa [#allocation4 + $0x1], 0  ;;  %s564_s9 = smov 0   ;;  %s566_s10 = smov 0  }
   0x4   :  { %s568_s11 = smov 0   ;;  %s570_s12 = smov 0  }
   0x5   :  { %s572_s13 = smov 0   ;;  %s574_s14 = smov 0  }
   0x6 LB: > { %s343_s15 = sadd.s32 4294967295, %s541_s14   ;;  %s344_s16 = sadd.s32 4294967294, %s541_s14   ;;  %s541_s14 = sphi %s574_s14, %s18_s14   ;;  %s537_s13 = sphi %s572_s13, %s757_s13   ;;  %s533_s12 = sphi %s570_s12, %s756_s12   ;;  %s529_s11 = sphi %s568_s11, %s755_s11   ;;  %s525_s10 = sphi %s566_s10, %s754_s10   ;;  %s521_s9 = sphi %s564_s9, %s753_s9  }
   0x7   : > { %s30_s17 = sadd.s32 1, %s537_s13  ;;  %s39_s18 = sadd.s32 1, %s529_s11 }
   0x8   : > { %p32_p0 = scmp.ge.s32.totalorder %s30_s17, 8  ;;  %p46_p1 = scmp.ne.s32.totalorder %s529_s11, %s525_s10 }
   0x9   : > { %p47_p2 = scmp.eq.s32.totalorder %s541_s14, 0  ;;  %p52_p3 = scmp.ne.s32.totalorder %s525_s10, %s521_s9 }
   0xa   : > { %s759_s17 = smov (%p32_p0, %s30_s17), 0  ;;  %p53_p5 = scmp.eq.s32.totalorder %s343_s15, 0 }
   0xb   : > { %p605_p4 = por %p47_p2, %p46_p1  ;;  %s34_s20 = ssub.s32 %s537_s13, %s759_s17 }
   0xc   : > { %p106_p6 = scmp.eq.s32.totalorder %s343_s15, 7  ;;  %p37_p7 = scmp.eq.s32.totalorder %s34_s20, 0 }
   0xd   : > { %p611_p8 = por %p53_p5, %p52_p3  ;;  %p112_p10 = scmp.eq.s32.totalorder %s344_s16, 7 }
   0xe   : > { %p615_p9 = por %p106_p6, %p46_p1  ;;  %p375_p12 = scmp.lt.s32.totalorder %s541_s14, 8 }
   0xf   : > { %s620_s23 = scalar_select %p37_p7, %s529_s11, %s39_s18  }
  0x10   : > { %s747_s22 = scalar_select %p615_p9, 1, 0 }
  0x11   : > { %p622_p11 = por %p112_p10, %p52_p3  ;;  %s132_s25 = sand.u32 1, %s529_s11  }
  0x12   : > { %s347_s26 = sshll.u32 %s132_s25, 4  ;;  %s361_s27 = sshll.u32 %s537_s13, 8 }
  0x13   : > { %s748_s24 = scalar_select %p622_p11, 1, 0 }
  0x14   : > { %s632_s30 = scalar_lea.hbm %s741_s0, %s361_s27  ;;  %s136_s3 = scalar_lea.vmem [#allocation2], %s347_s26 }
  0x15   : > { %s144_s4 = sshll.u32 %s136_s3, 4  ;;  %p638_p13 = pnand %p375_p12, %p605_p4  ;;  %s634_s4 = int_to_ptr.vmem [resolvable:$true] %s144_s4 }
  0x16   : > { %s643_s6 = scalar_lea.sflag [#allocation3], %s132_s25  ;;  %s429_s7 = scalar_lea.hbm %s632_s30, 256 }
  0x17   : > { %p430_p1 = scmp.ne.s32.totalorder %s632_s30, %s429_s7  ;;  %p431_p2 = pneg %p638_p13 }
  0x18   : > { %s434_s16 = scalar_lea.hbm %s741_s0, 2048  ;;  %p435_p4 = scmp.lt.u32.totalorder %s632_s30, %s741_s0 }
  0x19   : > { %p432_p3 = pnand %p431_p2, %p430_p1  ;;  %p436_p6 = scmp.lt.u32.totalorder %s434_s16, %s429_s7 }
  0x1a   : > { %p438_p10 = scmp.lt.u32.totalorder %s429_s7, %s632_s30 }
  0x1b   : > { %p433_p5 = pneg %p432_p3  ;;  %p437_p7 = por %p436_p6, %p435_p4 }
  0x1d   : > { %p439_p12 = por %p438_p10, %p437_p7 }
  0x1f   : > { %p440_p0 = pnand %p439_p12, %p433_p5 }
  0x21   : > { %443 = shalt.err (!%p440_p0)
}
  0x22   : > { %s444_s20 = scalar_lea.vmem %s634_s4, 256  ;;  %s543_s25 = smov [#allocation2]  }
  0x23   : > { %p445_p1 = scmp.ne.s32.totalorder %s634_s4, %s444_s20  ;;  %s449_s26 = sshll.u32 %s543_s25, 4  ;;  %s450_s26 = int_to_ptr.vmem [resolvable:$false] %s449_s26 }
  0x24   : > { %s451_s27 = scalar_lea.vmem %s450_s26, 512  ;;  %p452_p9 = scmp.lt.s32.totalorder %s634_s4, %s450_s26 }
  0x25   : > { %p447_p3 = pnand %p445_p1, %p431_p2  ;;  %p453_p4 = scmp.lt.s32.totalorder %s451_s27, %s444_s20 }
  0x27   : > { %p448_p11 = pneg %p447_p3  ;;  %p454_p6 = por %p453_p4, %p452_p9 }
  0x29   : > { %p455_p7 = pnand %p454_p6, %p448_p11 }
  0x2b   : > { %458 = shalt.err (!%p455_p7)
}
  0x2c   : > { %s544_s28 = smov 128   ;;  %s545_s29 = smov 8  }
  0x2d   : > { %370 = dma.hbm_to_vmem [thread:$0]  (!%p638_p13), %s632_s30, 256, %s634_s4, %s643_s6, %s544_s28, %s544_s28, %s545_s29  }
  0x2e   : > { %p163_p0 = scmp.lt.s32.totalorder %s541_s14, 9  ;;  %p750_p2 = scmp.ge.s32.totalorder %s541_s14, 1 }
  0x30   : > { %p164_p5 = pnand %p750_p2, %p163_p0 }
  0x31   : > { %s675_s3 = sand.u32 (!%p164_p5), 1, %s525_s10  }
  0x32   : > { %167 = sbr.rel (%p164_p5) target bundleno = 87 (0x57), region = 28  ;;  %s351_s7 = sshll.u32 (!%p164_p5), %s675_s3, 4 }
  0x33   : > { %s170_s8 = scalar_lea.sflag (!%p164_p5), [#allocation3], %s675_s3  ;;  %s173_s15 = scalar_lea.vmem (!%p164_p5), [#allocation2], %s351_s7 }
  0x39   : > { %512 = dma.done.wait (%p611_p8), %s170_s8, 256  }
  0x3a   : > { %514 = vsyncadd (%p611_p8), %s170_s8, 4294967040  ;;  %s353_s30 = sshll.u32 %s533_s12, 1  ;;  %s200_s4 = scalar_lea.vmem [#allocation5], %s351_s7  ;;  %v211_v0 = vld [vmem:[%s173_s15] sm:$0xff]  ;;  %v212_v2 = vld [vmem:[%s173_s15 + $0x8] sm:$0xff] }
  0x3b   : > { %p203_p9 = scmp.lt.s32.totalorder %s353_s30, 63  ;;  %s246_s5 = sshll.u32 %s200_s4, 4  ;;  %s688_s5 = int_to_ptr.vmem [resolvable:$true] %s246_s5 }
  0x3c   : > { %s362_s19 = sshll.u32 %s533_s12, 8  ;;  %s232_s26 = scalar_lea.sflag [#allocation4], %s675_s3 }
  0x3d   : > { %s761_s30 = smov (!%p203_p9, %s353_s30), 63  ;;  %s693_s25 = scalar_lea.hbm %s743_s2, %s362_s19 }
  0x3e   : > { %s208_s18 = scalar_lea.vmem %s742_s1, %s761_s30  ;;  %s459_s12 = scalar_lea.vmem %s688_s5, 256 }
  0x3f   : > { %v354_v1 = vld [vmem:[%s208_s18] ss:$0 sm:$0xff]  ;;  %v355_v4 = vld [vmem:[%s208_s18 + $0x1] ss:$0 sm:$0xff]  ;;  %p460_p8 = scmp.ne.s32.totalorder %s688_s5, %s459_s12  ;;  %p751_p11 = scmp.ne.s32.totalorder %s747_s22, 0 }
  0x40   : > { %v227_v3 = vadd.f32 %v354_v1, %v211_v0  ;;  %v228_v5 = vadd.f32 %v355_v4, %v212_v2  ;;  %s546_s27 = smov [#allocation5]  }
  0x41   : > { %p461_p13 = pnand %p460_p8, %p751_p11  ;;  %s463_s28 = sshll.u32 %s546_s27, 4  ;;  %s464_s28 = int_to_ptr.vmem [resolvable:$false] %s463_s28 }
  0x42   : > { %229 = vst [vmem:[%s200_s4] sm:$0xff] %v227_v3  ;;  %230 = vst [vmem:[%s200_s4 + $0x8] sm:$0xff] %v228_v5  ;;  %s465_s29 = scalar_lea.vmem %s464_s28, 512  ;;  %p466_p12 = scmp.lt.s32.totalorder %s688_s5, %s464_s28 }
  0x43   : > { %p462_p10 = pneg %p461_p13  ;;  %p467_p1 = scmp.lt.s32.totalorder %s465_s29, %s459_s12 }
  0x45   : > { %p468_p3 = por %p467_p1, %p466_p12 }
  0x47   : > { %p469_p4 = pnand %p468_p3, %p462_p10 }
  0x49   : > { %472 = shalt.err (!%p469_p4)
}
  0x4a   : > { %s473_s7 = scalar_lea.hbm %s693_s25, 256  ;;  %s477_s30 = scalar_lea.hbm %s743_s2, 2048 }
  0x4b   : > { %p474_p6 = scmp.ne.s32.totalorder %s693_s25, %s473_s7  ;;  %p478_p2 = scmp.lt.u32.totalorder %s693_s25, %s743_s2 }
  0x4c   : > { %p479_p5 = scmp.lt.u32.totalorder %s477_s30, %s473_s7  ;;  %p481_p8 = scmp.lt.u32.totalorder %s473_s7, %s693_s25 }
  0x4d   : > { %p475_p7 = pnand %p474_p6, %p751_p11 }
  0x4e   : > { %p480_p9 = por %p479_p5, %p478_p2 }
  0x4f   : > { %p476_p0 = pneg %p475_p7 }
  0x50   : > { %p482_p13 = por %p481_p8, %p480_p9 }
  0x52   : > { %p483_p10 = pnand %p482_p13, %p476_p0 }
  0x54   : > { %486 = shalt.err (!%p483_p10)
}
  0x55   : > { %s547_s16 = smov 128   ;;  %s548_s18 = smov 8  }
  0x56   : > { %365 = dma.vmem_to_hbm [thread:$0]  (%p751_p11), %s688_s5, 256, %s693_s25, %s232_s26, %s547_s16, %s547_s16, %s548_s18  }
  0x57 PF: > { %p376_p12 = scmp.ge.s32.totalorder %s541_s14, 2  ;;  %s261_s19 = sand.u32 1, %s521_s9  }
  0x58   : > { %p752_p1 = scmp.ne.s32.totalorder %s748_s24, 0  ;;  %s262_s21 = scalar_lea.sflag [#allocation4], %s261_s19 }
  0x5a   : > { %p372_p3 = pnand %p376_p12, %p752_p1 }
  0x5c   : > { %516 = dma.done.wait (!%p372_p3), %s262_s21, 256  }
  0x5d   : > { %518 = vsyncadd (!%p372_p3), %s262_s21, 4294967040  ;;  %s18_s14 = sadd.s32 1, %s541_s14   ;;  %s753_s9 = smov %s525_s10 }
  0x5e   : > { %p15_p4 = scmp.ge.s32.totalorder %s18_s14, 10   ;;  %s754_s10 = smov %s529_s11 }
  0x5f   : > { %s755_s11 = smov %s620_s23  ;;  %s756_s12 = smov %s537_s13 }
  0x60   : > { %s757_s13 = smov %s759_s17  ;;  %17 = sbr.rel (!%p15_p4) target bundleno = 6 (0x6), region = 76 }
  0x67   :  { %267 = vsyncpa [#allocation3], 1 }
  0x68   :  { %269 = vsyncpa [#allocation3 + $0x1], 1 }
  0x69   :  { %270 = vsyncpa [#allocation4], 1 }
  0x6a   :  { %272 = vsyncpa [#allocation4 + $0x1], 1 }

</bundles_post_ra>
